<compile_context>
chip_gen: v5e
topology: v5e:2x2
jax: 0.10.0
libtpu: 0.0.40
codegen_flags: <defaults>
</compile_context>

<pallas_src>
import functools
import math

import jax
import jax.numpy as jnp
import numpy as np
from jax.experimental import pallas as pl
from jax.experimental.pallas import tpu as pltpu


# ----------------------------- Pallas kernel --------------------------------
def _graph_conv_kernel(x_ref, gso_blk_ref, w_blk_ref, bias_ref, out_ref, *,
                       mxu_dtype):
    # x_ref:       (B*C, TNp)  activation rows; lanes = fused (t, n), f32
    # gso_blk_ref: (TNp, TNp)  kron(I_T, gso^T), zero-padded      (resident)
    # w_blk_ref:   (B*C, B*C)  kron(I_B, W^T)                     (resident)
    # bias_ref:    (B*C, 1)    bias[c] at row b*C + c             (resident)
    # out_ref:     (B*C, TNp)
    x = x_ref[...]                                      # f32, kept for exact residual

    # Graph contraction over the node dim, batched over every (b, c, t) via the
    # block-diagonal lift: one lane-dense (rows, 128) @ (128, 128) MXU pass.
    xg = jnp.dot(x.astype(mxu_dtype), gso_blk_ref[...],
                 preferred_element_type=jnp.float32)    # (B*C, TNp)

    # Channel mixing (W^T per batch element) as one tiny left matmul.
    y = jnp.dot(w_blk_ref[...], xg.astype(mxu_dtype),
                preferred_element_type=jnp.float32)     # (B*C, TNp)

    # f32 epilogue: bias + residual, one full-width (unmasked) store.
    out_ref[...] = (y + bias_ref[...] + x).astype(out_ref.dtype)


# ------------------------------ Layer builder --------------------------------
def make_graph_conv_layer(gso, weight, bias, *, batch_size, n_time,
                          mxu_dtype=jnp.float32):
    """Build the GraphConvLayer forward for fixed (B, T).

    All resident operands (block-diagonal gso, block-diagonal W^T, repeated
    bias, optional bf16 casts) are precomputed HERE, once, at layer init —
    nothing but a free reshape happens on the per-call path.
    """
    N = gso.shape[0]
    C = weight.shape[0]
    B, T = batch_size, n_time
    BC, TN = B * C, T * N

    # Pad the fused (t, n) lane dim up to a multiple of 128 so every vector
    # load / store is unmasked.  (No-op at the test size: T*N = 8*16 = 128.)
    TNp = max(128, ((TN + 127) // 128) * 128)

    # kron(I_T, gso^T): applies X_t @ gso^T to all T timesteps in one matmul.
    gso_blk = jnp.kron(jnp.eye(T, dtype=jnp.float32), gso.T)          # (TN, TN)
    gso_blk = jnp.pad(gso_blk, ((0, TNp - TN), (0, TNp - TN)))        # (TNp, TNp)
    # kron(I_B, W^T): applies W^T to the C channel-rows of every batch element.
    w_blk = jnp.kron(jnp.eye(B, dtype=jnp.float32), weight.T)         # (BC, BC)
    bias_rep = jnp.tile(bias, B).reshape(BC, 1)                       # (BC, 1)

    # bf16-in-HBM weights for the bf16-MXU path (f32 accumulate in-kernel).
    gso_blk = gso_blk.astype(mxu_dtype)
    w_blk = w_blk.astype(mxu_dtype)

    kernel = functools.partial(_graph_conv_kernel, mxu_dtype=mxu_dtype)

    call = pl.pallas_call(
        kernel,
        out_shape=jax.ShapeDtypeStruct((BC, TNp), jnp.float32),
        grid=(1,),  # single step: the whole problem is one vreg of activation
        in_specs=[
            pl.BlockSpec((BC, TNp), lambda i: (0, 0)),    # activation slab
            pl.BlockSpec((TNp, TNp), lambda i: (0, 0)),   # kron(I_T, gso^T)  (resident)
            pl.BlockSpec((BC, BC), lambda i: (0, 0)),     # kron(I_B, W^T)    (resident)
            pl.BlockSpec((BC, 1), lambda i: (0, 0)),      # bias              (resident)
        ],
        out_specs=pl.BlockSpec((BC, TNp), lambda i: (0, 0)),
        # NOTE: for production sizes on v7x (64 MiB VMEM), single-buffer the
        # resident weights (pipeline_mode=pl.Buffered(1)) and tile T through a
        # "parallel" batch/time grid axis so both TensorCores get work.
        compiler_params=pltpu.CompilerParams(
            dimension_semantics=("arbitrary",)),
    )

    def forward(x_gc_in):
        # x_gc_in: (B, C, T, N) f32 NCHW, already aligned.
        # Contiguous, layout-preserving reshape — NOT a transpose.
        x2 = x_gc_in.reshape(BC, TN)
        if TNp != TN:
            x2 = jnp.pad(x2, ((0, 0), (0, TNp - TN)))
        out = call(x2, gso_blk, w_blk, bias_rep)
        return out[:, :TN].reshape(B, C, T, N)

    return forward


# ------------------------------- Align glue ---------------------------------
# TODO(synk): Time_analysis.Align is not part of the provided source; this is
# the canonical STGCN Align (1x1 conv if c_in > c_out, zero-pad channels if
# c_in < c_out, identity otherwise).  Identity in this test (c_in == c_out).
def align(x, c_in, c_out, align_w=None, align_b=None):
    # x: (B, c_in, T, N) NCHW
    if c_in > c_out:
        y = jnp.einsum('oc,bctn->botn', align_w, x) + align_b[None, :, None, None]
        return y
    elif c_in < c_out:
        B, _, T, N = x.shape
        pad = jnp.zeros((B, c_out - c_in, T, N), dtype=x.dtype)
        return jnp.concatenate([x, pad], axis=1)
    else:
        return x


# ------------------------------ Reference (JAX) -----------------------------
def _reference(x_gc_in, gso, weight, bias):
    xp = jnp.transpose(x_gc_in, (0, 2, 3, 1))                    # (B, T, N, C)
    first = jnp.einsum('hi,btij->bthj', gso, xp)
    second = jnp.einsum('bthi,ij->bthj', first, weight)
    gc = second + bias
    return jnp.transpose(gc, (0, 3, 1, 2)) + x_gc_in


# --------------------------------- Main --------------------------------------
if __name__ == "__main__":
    B, C_IN, C_OUT, T, N = 2, 4, 4, 8, 16   # x: (B, c_in, T, N) NCHW

    key = jax.random.PRNGKey(0)
    k_x, k_gso, k_w, k_b = jax.random.split(key, 4)

    x = jax.random.normal(k_x, (B, C_IN, T, N), dtype=jnp.float32)

    # Deterministic gso: symmetric, row-normalized "adjacency"-like matrix.
    a = jax.random.uniform(k_gso, (N, N), dtype=jnp.float32)
    a = 0.5 * (a + a.T) + jnp.eye(N, dtype=jnp.float32)
    gso = a / jnp.sum(a, axis=1, keepdims=True)

    # GraphConv parameters (kaiming_uniform-style bounds, deterministic).
    # torch fan_in for a (c_in, c_out) 2-D weight is size(1) = c_out.
    fan_in = C_OUT
    w_bound = 1.0 / math.sqrt(fan_in)
    weight = jax.random.uniform(k_w, (C_OUT, C_OUT), dtype=jnp.float32,
                                minval=-w_bound, maxval=w_bound)
    bias = jax.random.uniform(k_b, (C_OUT,), dtype=jnp.float32,
                              minval=-w_bound, maxval=w_bound)

    # Align (identity here since c_in == c_out).
    x_gc_in = align(x, C_IN, C_OUT)

    ref = _reference(x_gc_in, gso, weight, bias)

    # f32 path (default): must match the reference tightly.
    layer = make_graph_conv_layer(gso, weight, bias, batch_size=B, n_time=T)
    out = jax.block_until_ready(layer(x_gc_in))
    np.testing.assert_allclose(np.asarray(out), np.asarray(ref),
                               rtol=1e-5, atol=1e-5)

    # bf16-MXU path (v6e/v7x): weights live in HBM as bf16 (pre-cast at layer
    # init), f32 accumulation, f32 residual/epilogue.  Looser tolerance comes
    # from bf16 quantization of the MXU operands.
    layer_bf16 = make_graph_conv_layer(gso, weight, bias, batch_size=B,
                                       n_time=T, mxu_dtype=jnp.bfloat16)
    out_bf16 = jax.block_until_ready(layer_bf16(x_gc_in))
    np.testing.assert_allclose(np.asarray(out_bf16), np.asarray(ref),
                               rtol=3e-2, atol=3e-2)

    print("KERNEL_OK")
</pallas_src>

<mosaic_0001>
module attributes {stable_mosaic.version = 11 : i64} {
  func.func @_graph_conv_kernel(%arg0: i32, %arg1: memref<8x128xf32, #tpu.memory_space<vmem>>, %arg2: memref<128x128xf32, #tpu.memory_space<vmem>>, %arg3: memref<8x8xf32, #tpu.memory_space<vmem>>, %arg4: memref<8x1xf32, #tpu.memory_space<vmem>>, %arg5: memref<8x128xf32, #tpu.memory_space<vmem>>) attributes {dimension_semantics = [#tpu.dimension_semantics<arbitrary>], iteration_bounds = array<i64: 1>, scalar_prefetch = 0 : i64, scratch_operands = 0 : i64, tpu.core_type = #tpu.core_type<tc>, window_params = [{pipeline_mode = #tpu.pipeline_mode<synchronous>, transform_indices = @transform_0, window_bounds = array<i64: 8, 128>}, {pipeline_mode = #tpu.pipeline_mode<synchronous>, transform_indices = @transform_1, window_bounds = array<i64: 128, 128>}, {pipeline_mode = #tpu.pipeline_mode<synchronous>, transform_indices = @transform_2, window_bounds = array<i64: 8, 8>}, {pipeline_mode = #tpu.pipeline_mode<synchronous>, transform_indices = @transform_3, window_bounds = array<i64: 8, 1>}, {pipeline_mode = #tpu.pipeline_mode<synchronous>, transform_indices = @transform_4, window_bounds = array<i64: 8, 128>}]} {
    %c0 = arith.constant 0 : index
    %c0_0 = arith.constant 0 : index
    %0 = vector.load %arg1[%c0, %c0_0] : memref<8x128xf32, #tpu.memory_space<vmem>>, vector<8x128xf32>
    %c0_1 = arith.constant 0 : index
    %c0_2 = arith.constant 0 : index
    %1 = vector.load %arg2[%c0_1, %c0_2] : memref<128x128xf32, #tpu.memory_space<vmem>>, vector<128x128xf32>
    %cst = arith.constant dense<0.000000e+00> : vector<8x128xf32>
    %2 = tpu.matmul %0, %1, %cst {dimension_numbers = #tpu.dot_dimension_numbers<[1], [0], [0], [1], [0, 0, 1, 1], [], []>} : vector<8x128xf32>, vector<128x128xf32>, vector<8x128xf32> -> vector<8x128xf32>
    %c0_3 = arith.constant 0 : index
    %c0_4 = arith.constant 0 : index
    %3 = vector.load %arg3[%c0_3, %c0_4] : memref<8x8xf32, #tpu.memory_space<vmem>>, vector<8x8xf32>
    %cst_5 = arith.constant dense<0.000000e+00> : vector<8x128xf32>
    %4 = tpu.matmul %3, %2, %cst_5 {dimension_numbers = #tpu.dot_dimension_numbers<[1], [0], [0], [1], [0, 0, 1, 1], [], []>} : vector<8x8xf32>, vector<8x128xf32>, vector<8x128xf32> -> vector<8x128xf32>
    %c0_6 = arith.constant 0 : index
    %c0_7 = arith.constant 0 : index
    %5 = vector.load %arg4[%c0_6, %c0_7] : memref<8x1xf32, #tpu.memory_space<vmem>>, vector<8x1xf32>
    %6 = vector.broadcast %5 : vector<8x1xf32> to vector<8x128xf32>
    %7 = arith.addf %4, %6 : vector<8x128xf32>
    %8 = arith.addf %7, %0 : vector<8x128xf32>
    %c0_8 = arith.constant 0 : index
    %c0_9 = arith.constant 0 : index
    %9 = vector.load %arg5[%c0_8, %c0_9] : memref<8x128xf32, #tpu.memory_space<vmem>>, vector<8x128xf32>
    tpu.vector_store %arg5[%c0_8, %c0_9], %8 {strides = array<i32>} : memref<8x128xf32, #tpu.memory_space<vmem>>, vector<8x128xf32>,
    return
  }
  func.func @transform_0(%arg0: i32) -> (i32, i32) {
    %c0_i32 = arith.constant 0 : i32
    %c0_i32_0 = arith.constant 0 : i32
    %c0_i32_1 = arith.constant 0 : i32
    return %c0_i32, %c0_i32_0 : i32, i32
  }
  func.func @transform_1(%arg0: i32) -> (i32, i32) {
    %c0_i32 = arith.constant 0 : i32
    %c0_i32_0 = arith.constant 0 : i32
    %c0_i32_1 = arith.constant 0 : i32
    return %c0_i32, %c0_i32_0 : i32, i32
  }
  func.func @transform_2(%arg0: i32) -> (i32, i32) {
    %c0_i32 = arith.constant 0 : i32
    %c0_i32_0 = arith.constant 0 : i32
    %c0_i32_1 = arith.constant 0 : i32
    return %c0_i32, %c0_i32_0 : i32, i32
  }
  func.func @transform_3(%arg0: i32) -> (i32, i32) {
    %c0_i32 = arith.constant 0 : i32
    %c0_i32_0 = arith.constant 0 : i32
    %c0_i32_1 = arith.constant 0 : i32
    return %c0_i32, %c0_i32_0 : i32, i32
  }
  func.func @transform_4(%arg0: i32) -> (i32, i32) {
    %c0_i32 = arith.constant 0 : i32
    %c0_i32_0 = arith.constant 0 : i32
    %c0_i32_1 = arith.constant 0 : i32
    return %c0_i32, %c0_i32_0 : i32, i32
  }
}

</mosaic_0001>

<bundles_post_ra>
// kernel: tpu_custom_call.1
= control target key start
LH: loop header
LB: loop body
LE: loop exit
PB: predicated region body
PF: predicated region fallthrough
CT: control target
= control target key end

     0   :  { %9 = vsyncpa [#allocation3], 0  ;;  %s268_s0 = inlined_call_operand.vmem [shape: f32[8,128], index: 0, kind: input, shape index: {}]   ;;  %s269_s1 = inlined_call_operand.hbm [shape: f32[128,128], index: 1, kind: input, shape index: {}]   ;;  %s270_s2 = inlined_call_operand.hbm [shape: f32[8,8], index: 2, kind: input, shape index: {}]   ;;  %s271_s3 = inlined_call_operand.vmem [shape: f32[8,1], index: 3, kind: input, shape index: {}]   ;;  %s272_s4 = inlined_call_operand.hbm [shape: f32[8,128], index: 4, kind: output, shape index: {}]  }
   0x1   :  { %10 = vsyncpa [#allocation6], 0 }
   0x2   :  { %11 = vsyncpa [#allocation4], 0  ;;  %s18_s17 = sshll.u32 %s269_s1, 4  ;;  %s222_s18 = smov [#allocation2]   ;;  %s19_s17 = int_to_ptr.hbm [resolvable:$true] %s18_s17 }
   0x3   :  { %s20_s19 = sshll.u32 %s222_s18, 4  ;;  %s32_s22 = sshll.u32 %s270_s2, 4  ;;  %s21_s19 = int_to_ptr.vmem [resolvable:$true] %s20_s19  ;;  %s33_s22 = int_to_ptr.hbm [resolvable:$true] %s32_s22 }
   0x4   :  { %s223_s23 = smov 128   ;;  %s224_s24 = smov 8  }
   0x5   :  { %26 = dma.hbm_to_vmem [thread:$0]  %s19_s17, 2048, %s21_s19, [#allocation3], %s223_s23, %s223_s23, %s224_s24  }
   0x6   :  { %s225_s25 = smov [#allocation5]  }
   0x7   :  { %s34_s26 = sshll.u32 %s225_s25, 4  ;;  %s35_s26 = int_to_ptr.vmem [resolvable:$true] %s34_s26 }
   0x8   :  { %37 = dma.hbm_to_vmem [thread:$0]  %s33_s22, 128, %s35_s26, [#allocation6]  }
   0x9   :  { %216 = dma.done.wait [#allocation3], 2048  }
   0xa   :  { %217 = vsyncadd [#allocation3], 4294965248 }
   0xb   :  { %218 = dma.done.wait [#allocation6], 128  }
   0xc   :  { %219 = vsyncadd [#allocation6], 4294967168  ;;  %v64_v0 = vld [vmem:[#allocation2 + $0x78] sm:$0xff]  ;;  %v63_v1 = vld [vmem:[#allocation2 + $0x70] sm:$0xff]  ;;  %v226_v18 = vmov 0   ;;  %vm92_vm0 = vcmask 64512  }
   0xd   :  { %65 = vmatpush.msra.mxu0 %v64_v0  ;;  %v62_v2 = vld [vmem:[#allocation2 + $0x68] sm:$0xff]  ;;  %v61_v3 = vld [vmem:[#allocation2 + $0x60] sm:$0xff]  ;;  %v60_v4 = vld [vmem:[#allocation2 + $0x58] sm:$0xff]  ;;  %143 = vset.pattern.permute.xlu0 %v226_v18  ;;  %s227_s29 = smov [#allocation7]   ;;  %s125_s6 = sshll.u32 %s272_s4, 4  ;;  %s126_s6 = int_to_ptr.hbm [resolvable:$true] %s125_s6 }
   0xe   :  { %v59_v5 = vld [vmem:[#allocation2 + $0x50] sm:$0xff]  ;;  %v58_v6 = vld [vmem:[#allocation2 + $0x48] sm:$0xff]  ;;  %v57_v7 = vld [vmem:[#allocation2 + $0x40] sm:$0xff]  ;;  %s123_s30 = sshll.u32 %s227_s29, 4  ;;  %s124_s30 = int_to_ptr.vmem [resolvable:$true] %s123_s30 }
   0xf   :  { %66 = vmatpush.msra.mxu0 %v63_v1  ;;  %v56_v8 = vld [vmem:[#allocation2 + $0x38] sm:$0xff]  ;;  %v55_v9 = vld [vmem:[#allocation2 + $0x30] sm:$0xff]  ;;  %v54_v10 = vld [vmem:[#allocation2 + $0x28] sm:$0xff] }
  0x10   :  { %v53_v11 = vld [vmem:[#allocation2 + $0x20] sm:$0xff]  ;;  %v52_v12 = vld [vmem:[#allocation2 + $0x18] sm:$0xff]  ;;  %v51_v13 = vld [vmem:[#allocation2 + $0x10] sm:$0xff] }
  0x11   :  { %67 = vmatpush.msra.mxu0 %v62_v2  ;;  %v50_v14 = vld [vmem:[#allocation2 + $0x8] sm:$0xff]  ;;  %v49_v15 = vld [vmem:[#allocation2] sm:$0xff] }
  0x12   :  { %v48_v16 = vld [vmem:[%s268_s0] sm:$0xff] }
  0x13   :  { %68 = vmatpush.msra.mxu0 %v61_v3  ;;  %v86_v17 = vld [vmem:[%s271_s3] sm:$0xff] }
  0x14   :  { %89 = vperm.xlu0 %143, %v86_v17   ;;  %v85_v19 = vld [vmem:[#allocation5] sm:$0xff] }
  0x15   :  { %69 = vmatpush.msra.mxu0 %v60_v4 }
  0x17   :  { %70 = vmatpush.msra.mxu0 %v59_v5 }
  0x19   :  { %71 = vmatpush.msra.mxu0 %v58_v6 }
  0x1b   :  { %72 = vmatpush.msra.mxu0 %v57_v7 }
  0x1d   :  { %73 = vmatpush.msra.mxu0 %v56_v8 }
  0x1f   :  { %74 = vmatpush.msra.mxu0 %v55_v9 }
  0x21   :  { %75 = vmatpush.msra.mxu0 %v54_v10 }
  0x23   :  { %76 = vmatpush.msra.mxu0 %v53_v11 }
  0x25   :  { %77 = vmatpush.msra.mxu0 %v52_v12 }
  0x27   :  { %78 = vmatpush.msra.mxu0 %v51_v13 }
  0x29   :  { %79 = vmatpush.msra.mxu0 %v50_v14 }
  0x2b   :  { %80 = vmatpush.msra.mxu0 %v49_v15 }
  0x2c   :  { %81 = vmatmul.f32.vlgmr.msra.gmra.mxu0 %v48_v16 }
  0x86   :  { %v90_v21 = vpop.permute.xlu0 %89 }
  0xa9   :  { %v82_v20 = vpop.f32.mrf.mxu0 }
  0xaa   :  { %111 = vmatpush.msra.mxu1 %v82_v20 }
  0xab   :  { %136 = vmatmul.msk.f32.vlgmr.msra.gmra.mxu1 %vm92_vm0, %v85_v19 }
 0x128   :  { %v113_v22 = vpop.f32.mrf.mxu1 }
 0x129   :  { %v114_v23 = vadd.f32 %v113_v22, %v90_v21 }
 0x12b   :  { %v116_v24 = vadd.f32 %v114_v23, %v48_v16 }
 0x12d   :  { %117 = vst [vmem:[#allocation7] sm:$0xff] %v116_v24 }
 0x12e   :  { %128 = dma.vmem_to_hbm [thread:$0]  %s124_s30, 128, %s126_s6, [#allocation4]  }
 0x12f   :  { %220 = dma.done.wait [#allocation4], 128  }
 0x130   :  { %221 = vsyncadd [#allocation4], 4294967168 }
 0x131   :  { %133 = vsyncpa [#allocation3], 1 }
 0x132   :  { %134 = vsyncpa [#allocation6], 1 }
 0x133   :  { %135 = vsyncpa [#allocation4], 1 }

</bundles_post_ra>
